<compile_context>
chip_gen: v5e
topology: v5e:2x2
jax: 0.10.0
libtpu: 0.0.40
codegen_flags: <defaults>
</compile_context>

<pallas_src>
import functools

import jax
import jax.numpy as jnp
from jax.experimental import pallas as pl
from jax.experimental.pallas import tpu as pltpu


# ----------------------------------------------------------------------------
# pltpu.roll direction probe (one tiny pallas_call, cached).
# We need shifted[p] = x[p + off]; with np.roll semantics that is shift = -off.
# ----------------------------------------------------------------------------
@functools.lru_cache(maxsize=None)
def _roll_sign():
    def k(x_ref, o_ref):
        o_ref[...] = pltpu.roll(x_ref[...], shift=1, axis=1)

    with jax.ensure_compile_time_eval():
        x = jnp.tile(jnp.arange(128, dtype=jnp.float32)[None, :], (8, 1))
        y = pl.pallas_call(k, out_shape=jax.ShapeDtypeStruct((8, 128), jnp.float32))(x)
        # np.roll convention: y[p] = x[p - shift]  ->  y[0] == x[127]
        return -1 if bool(y[0, 0] == 127.0) else 1


# ----------------------------------------------------------------------------
# Kernel: one (batch, spatial-tile) grid cell of the whole MSA_1024 forward.
# Layout inside the kernel: (channels, flattened spatial) = (sublanes, lanes).
# ----------------------------------------------------------------------------
def _msa_kernel(fm_m_ref, fm_t_ref, fm_b_ref,
                fs_m_ref, fs_t_ref, fs_b_ref,
                w14_ref, b14_ref,
                w2_ref, b2_ref, w3_ref, b3_ref, w5_ref, b5_ref,
                out_ref,
                *, H, W, TILE, HALO, A2, A3, ROLL_SIGN):
    HW = H * W
    E = TILE + 2 * HALO
    C = out_ref.shape[1]                    # 16 struct channels
    t = pl.program_id(1)
    base = t * TILE - HALO                  # global flattened pos of ext column 0

    # Extended lane-dense views (halo | main | halo), concatenated along lanes.
    fm = jnp.concatenate([fm_t_ref[0], fm_m_ref[0], fm_b_ref[0]], axis=1)  # (32, E)
    fs = jnp.concatenate([fs_t_ref[0], fs_m_ref[0], fs_b_ref[0]], axis=1)  # (16, E)

    # Global-position border masks (image borders; also kill any wrap-around of
    # the lane rolls for positions whose taps leave the extended window).
    gpos = base + jax.lax.broadcasted_iota(jnp.int32, (1, E), 1)           # (1, E)
    col = (gpos + (-(-HALO // W)) * W) % W       # shift keeps the operand >= 0
    not_left = col != 0
    not_right = col != (W - 1)
    not_top = gpos >= W
    not_bot = gpos < (HW - W)

    # (tap offset, combined mask) for the nine 3x3 taps, built ONCE per tile.
    tap_off_mask = []
    for dy in range(3):
        for dx in range(3):
            m = None
            if dy == 0:
                m = not_top
            elif dy == 2:
                m = not_bot
            if dx == 0:
                m = not_left if m is None else m & not_left
            elif dx == 2:
                m = not_right if m is None else m & not_right
            tap_off_mask.append(((dy - 1) * W + (dx - 1), m))

    def lslice(a, off, width):              # lane slice (no-op when full width)
        return a if (off == 0 and width == a.shape[1]) else a[:, off:off + width]

    def conv3x3(x, in_off, out_off, out_w, w, b):
        # x lives on the lane window [in_off, in_off + x.shape[1]) of the
        # extended coords; compute the conv only on [out_off, out_off + out_w).
        in_w = x.shape[1]
        s = out_off - in_off                 # multiple of 128 by construction
        taps = []
        for off, m in tap_off_mask:
            r = x if off == 0 else pltpu.roll(x, shift=(ROLL_SIGN * off) % in_w,
                                              axis=1)
            p = lslice(r, s, out_w)
            if m is not None:
                p = jnp.where(lslice(m, out_off, out_w), p, 0.0)
            taps.append(p)
        stacked = jnp.concatenate(taps, axis=0)                        # (144, out_w)
        r = jnp.dot(w, stacked, preferred_element_type=jnp.float32)    # (16, out_w)
        return jnp.maximum(r + b, 0.0)       # BN scale folded into w; b = bias

    # conv4 (1x1, 32->16, BN folded) and conv1 (1x1, 32->1) share one matmul.
    yg = jnp.dot(w14_ref[...], fm, preferred_element_type=jnp.float32) + b14_ref[...]
    g = jax.nn.sigmoid(yg[C:C + 1, :])                # sigmoid(conv1(feat_mask))

    # Per-stage compute windows (all lane-aligned, nested, receptive-field safe).
    o2, w2w = HALO - A2, TILE + 2 * A2                # conv2 output window
    o3, w3w = HALO - A3, TILE + 2 * A3                # conv3 output window

    y = jnp.maximum(lslice(yg[0:C, :], o3, w3w), 0.0)  # relu(bn4(conv4)) on A3 win

    x = g * fs                                                     # gate * struct
    x = conv3x3(x, 0, o2, w2w, w2_ref[...], b2_ref[...])           # relu(bn2(conv2))
    x = conv3x3(x + lslice(fs, o2, w2w), o2, o3, w3w,
                w3_ref[...], b3_ref[...])                          # relu(bn3(conv3))
    x = conv3x3(x + y, o3, HALO, TILE, w5_ref[...], b5_ref[...])   # relu(bn5(conv5))

    out_ref[0] = x                                     # interior TILE lanes only


# ----------------------------------------------------------------------------
# Spatial tiling: TILE flattened positions per grid step + HALO on each side.
# The three chained 3x3 convs need a receptive-field margin of 3*(W+1).
# ----------------------------------------------------------------------------
def _ceil128(n):
    return -(-n // 128) * 128


def _choose_tiling(HW, W, target):
    halo = _ceil128(3 * (W + 1))
    while halo <= HW:
        if HW % halo == 0:
            tile = halo
            while (tile * 2 <= max(target, halo) and tile * 2 <= HW
                   and HW % (tile * 2) == 0):
                tile *= 2
            return tile, halo
        halo += 128
    # Degenerate fallback (tiny / odd spatial sizes): one tile, whole-image halo.
    return HW, HW


def msa_1024_pallas(feat_mask, feat_struct, params, *, tile_target=8192):
    """feat_mask: (B, 32, H, W), feat_struct: (B, 16, H, W) -> (B, 16, H, W)."""
    B, Cm, H, W = feat_mask.shape
    C = feat_struct.shape[1]
    HW = H * W

    # NCHW -> (B, C, H*W) is a free reshape: channels on sublanes, spatial on lanes.
    fm = feat_mask.reshape(B, Cm, HW)
    fs = feat_struct.reshape(B, C, HW)

    TILE, HALO = _choose_tiling(HW, W, tile_target)
    n_tiles = HW // TILE
    R = TILE // HALO                 # halo blocks per tile
    HB_MAX = HW // HALO - 1          # last valid halo-block index

    # Per-stage windows: conv2 needs +/-2(W+1), conv3 +/-(W+1), conv5 interior.
    if HALO % 128 == 0:
        A2 = min(_ceil128(2 * (W + 1)), HALO)
        A3 = min(_ceil128(W + 1), HALO)
    else:                            # degenerate fallback: keep full window
        A2 = A3 = HALO

    main_map = lambda b, t: (b, 0, t)
    top_map = lambda b, t: (b, 0, jnp.maximum(t * R - 1, 0))
    bot_map = lambda b, t: (b, 0, jnp.minimum((t + 1) * R, HB_MAX))

    def wspec(a):
        nd = a.ndim
        return pl.BlockSpec(a.shape, lambda b, t, _nd=nd: (0,) * _nd)

    in_specs = [
        pl.BlockSpec((1, Cm, TILE), main_map),
        pl.BlockSpec((1, Cm, HALO), top_map),
        pl.BlockSpec((1, Cm, HALO), bot_map),
        pl.BlockSpec((1, C, TILE), main_map),
        pl.BlockSpec((1, C, HALO), top_map),
        pl.BlockSpec((1, C, HALO), bot_map),
    ] + [wspec(a) for a in params]

    kernel = functools.partial(_msa_kernel, H=H, W=W, TILE=TILE, HALO=HALO,
                               A2=A2, A3=A3, ROLL_SIGN=_roll_sign())

    out = pl.pallas_call(
        kernel,
        out_shape=jax.ShapeDtypeStruct((B, C, HW), jnp.float32),
        grid=(B, n_tiles),
        in_specs=in_specs,
        out_specs=pl.BlockSpec((1, C, TILE), main_map),
        compiler_params=pltpu.CompilerParams(
            dimension_semantics=("parallel", "parallel"),
            vmem_limit_bytes=48 * 1024 * 1024),
    )(fm, fm, fm, fs, fs, fs, *params)

    return out.reshape(B, C, H, W)


# ----------------------------------------------------------------------------
# Parameter packing: fold eval-mode BN into the conv weights, tap-major reshape.
# ----------------------------------------------------------------------------
def prepare_params(w1, w2, w3, w4, w5, eps=1e-5):
    C = w2.shape[0]          # 16
    Cm = w4.shape[1]         # 32
    scale = jnp.float32(1.0 / jnp.sqrt(1.0 + eps))   # BN eval affine (fresh stats)
    bias16 = jnp.zeros((C, 1), jnp.float32)          # conv bias 0, BN beta 0

    def fold3x3(w):          # OIHW -> (Cout, 9*Cin), tap-major (dy, dx), BN folded
        wf = w.astype(jnp.float32) * scale
        return jnp.transpose(wf, (0, 2, 3, 1)).reshape(C, 9 * w.shape[1])

    w4f = w4[:, :, 0, 0].astype(jnp.float32) * scale      # (16, 32) BN folded
    w1f = w1[:, :, 0, 0].astype(jnp.float32)              # (1, 32)  no BN
    w14 = jnp.zeros((24, Cm), jnp.float32)                # pad rows to sublane mult.
    w14 = w14.at[:C].set(w4f).at[C].set(w1f[0])
    b14 = jnp.zeros((24, 1), jnp.float32)

    return (w14, b14, fold3x3(w2), bias16, fold3x3(w3), bias16,
            fold3x3(w5), bias16)


# ----------------------------------------------------------------------------
# Pure-JAX reference (same eval-mode BN semantics) for verification.
# ----------------------------------------------------------------------------
def _ref_forward(feat_mask, feat_struct, pt_weights, eps=1e-5):
    w1, w2, w3, w4, w5 = pt_weights

    def conv(x, w, pad):
        return jax.lax.conv_general_dilated(
            x, w, (1, 1), ((pad, pad), (pad, pad)),
            dimension_numbers=('NCHW', 'OIHW', 'NCHW'))

    def bn(x):   # gamma=1, beta=0, running_mean=0, running_var=1
        return x / jnp.sqrt(1.0 + eps)

    y = jax.nn.relu(bn(conv(feat_mask, w4, 0)))
    x = jax.nn.sigmoid(conv(feat_mask, w1, 0))
    x = x * feat_struct
    x = jax.nn.relu(bn(conv(x, w2, 1)))
    x = jax.nn.relu(bn(conv(x + feat_struct, w3, 1)))
    y = jax.nn.relu(bn(conv(x + y, w5, 1)))
    return y


def _kaiming(key, shape, fan_in):
    # kaiming_normal_(mode='fan_in', nonlinearity='relu'): std = sqrt(2 / fan_in)
    return jax.random.normal(key, shape, jnp.float32) * jnp.sqrt(2.0 / fan_in)


def _make_weights(key, Cm, C):
    kws = jax.random.split(key, 5)
    w1 = _kaiming(kws[0], (1, Cm, 1, 1), Cm)       # conv1
    w2 = _kaiming(kws[1], (C, C, 3, 3), C * 9)     # conv2
    w3 = _kaiming(kws[2], (C, C, 3, 3), C * 9)     # conv3
    w4 = _kaiming(kws[3], (C, Cm, 1, 1), Cm)       # conv4
    w5 = _kaiming(kws[4], (C, C, 3, 3), C * 9)     # conv5
    return w1, w2, w3, w4, w5


def _check(name, out, ref, atol=1e-3, rtol=1e-3):
    if out.shape != ref.shape:
        raise AssertionError(f"{name}: shape {out.shape} vs {ref.shape}")
    if not jnp.allclose(out, ref, atol=atol, rtol=rtol):
        raise AssertionError(
            f"{name} mismatch, max abs err = {float(jnp.max(jnp.abs(out - ref)))}")


if __name__ == "__main__":
    Cm, C = 32, 16          # feat_mask / feat_struct channels (fixed by the module)
    key = jax.random.PRNGKey(0)
    k1, k2, k3, k4, kw = jax.random.split(key, 5)
    weights = _make_weights(kw, Cm, C)
    params = prepare_params(*weights)

    # --- Test 1: 16x16 image (single-tile and 2-tile paths, no window trim) ----
    B, H, W = 2, 16, 16
    feat_mask = jax.random.normal(k1, (B, Cm, H, W), jnp.float32)
    feat_struct = jax.random.normal(k2, (B, C, H, W), jnp.float32)
    ref = _ref_forward(feat_mask, feat_struct, weights)

    out = jax.block_until_ready(
        msa_1024_pallas(feat_mask, feat_struct, params, tile_target=128))
    _check("16x16 multi-tile", out, ref)

    out1 = jax.block_until_ready(msa_1024_pallas(feat_mask, feat_struct, params))
    _check("16x16 single-tile", out1, ref)

    # --- Test 2: 8x256 image (multi-tile + per-stage window trimming active) ---
    B2, H2, W2 = 1, 8, 256
    fm2 = jax.random.normal(k3, (B2, Cm, H2, W2), jnp.float32)
    fs2 = jax.random.normal(k4, (B2, C, H2, W2), jnp.float32)
    ref2 = _ref_forward(fm2, fs2, weights)

    out2 = jax.block_until_ready(
        msa_1024_pallas(fm2, fs2, params, tile_target=1024))
    _check("8x256 trimmed multi-tile", out2, ref2)

    print("KERNEL_OK")
</pallas_src>

<mosaic_0001>
module attributes {stable_mosaic.version = 11 : i64} {
  func.func @k(%arg0: memref<8x128xf32, #tpu.memory_space<vmem>>, %arg1: memref<8x128xf32, #tpu.memory_space<vmem>>) attributes {dimension_semantics = [], scalar_prefetch = 0 : i64, scratch_operands = 0 : i64, tpu.core_type = #tpu.core_type<tc>} {
    %c0 = arith.constant 0 : index
    %c0_0 = arith.constant 0 : index
    %0 = vector.load %arg0[%c0, %c0_0] : memref<8x128xf32, #tpu.memory_space<vmem>>, vector<8x128xf32>
    %c1_i32 = arith.constant 1 : i32
    %1 = tpu.dynamic_rotate %0 by %c1_i32 dim 1 : vector<8x128xf32>, i32 -> vector<8x128xf32>
    %c0_1 = arith.constant 0 : index
    %c0_2 = arith.constant 0 : index
    %2 = vector.load %arg1[%c0_1, %c0_2] : memref<8x128xf32, #tpu.memory_space<vmem>>, vector<8x128xf32>
    tpu.vector_store %arg1[%c0_1, %c0_2], %1 {strides = array<i32>} : memref<8x128xf32, #tpu.memory_space<vmem>>, vector<8x128xf32>,
    return
  }
}

</mosaic_0001>

<bundles_post_ra>
// kernel: tpu_custom_call.1
= control target key start
LH: loop header
LB: loop body
LE: loop exit
PB: predicated region body
PF: predicated region fallthrough
CT: control target
= control target key end

     0   :  { %6 = vsyncpa [#allocation3], 0  ;;  %s118_s0 = inlined_call_operand.hbm [shape: f32[8,128], index: 0, kind: input, shape index: {}]   ;;  %s119_s1 = inlined_call_operand.hbm [shape: f32[8,128], index: 1, kind: output, shape index: {}]  }
   0x1   :  { %7 = vsyncpa [#allocation4], 0  ;;  %s13_s8 = sshll.u32 %s118_s0, 4  ;;  %s99_s9 = smov [#allocation2]   ;;  %s14_s8 = int_to_ptr.hbm [resolvable:$true] %s13_s8 }
   0x2   :  { %s15_s10 = sshll.u32 %s99_s9, 4  ;;  %s16_s10 = int_to_ptr.vmem [resolvable:$true] %s15_s10 }
   0x3   :  { %18 = dma.hbm_to_vmem [thread:$0]  %s14_s8, 128, %s16_s10, [#allocation3]  }
   0x4   :  { %95 = dma.done.wait [#allocation3], 128  }
   0x5   :  { %96 = vsyncadd [#allocation3], 4294967168  ;;  %v23_v0 = vld [vmem:[#allocation2] sm:$0xff]  ;;  %s100_s11 = smov 1   ;;  %s101_s12 = smov [#allocation5]  }
   0x6   :  { %24 = vrot.lane.b32.xlu0 %v23_v0, %s100_s11  ;;  %s32_s13 = sshll.u32 %s101_s12, 4  ;;  %s34_s16 = sshll.u32 %s119_s1, 4  ;;  %s33_s13 = int_to_ptr.vmem [resolvable:$true] %s32_s13  ;;  %s35_s16 = int_to_ptr.hbm [resolvable:$true] %s34_s16 }
  0x78   :  { %v25_v1 = vpop.permute.xlu0 %24 }
  0x79   :  { %26 = vst [vmem:[#allocation5] sm:$0xff] %v25_v1 }
  0x7a   :  { %37 = dma.vmem_to_hbm [thread:$0]  %s33_s13, 128, %s35_s16, [#allocation4]  }
  0x7b   :  { %97 = dma.done.wait [#allocation4], 128  }
  0x7c   :  { %98 = vsyncadd [#allocation4], 4294967168 }
  0x7d   :  { %42 = vsyncpa [#allocation3], 1 }
  0x7e   :  { %43 = vsyncpa [#allocation4], 1 }

</bundles_post_ra>
